<compile_context>
chip_gen: v7x
topology: tpu7x:2x2x1
jax: 0.10.0
libtpu: 0.0.40
codegen_flags: <defaults>
</compile_context>

<pallas_src>
import functools

import jax
import jax.numpy as jnp
from jax.experimental import pallas as pl
from jax.experimental.pallas import tpu as pltpu


def _round_up(x, m):
    return ((x + m - 1) // m) * m


def _spec_mask_mse_kernel(coef_ref, mix_ref, diff_ref, pred_ref, err_ref,
                          *, f_keep, mask_rows):
    # Fused 'net_sound' stand-in coefficients (scalar-prefetched into SMEM).
    w00 = coef_ref[0]
    w10 = coef_ref[1]
    w01 = coef_ref[2]
    w11 = coef_ref[3]
    b0 = coef_ref[4]
    b1 = coef_ref[5]

    mix = mix_ref[...].astype(jnp.float32)      # (b_tile, 2, tile_f, lanes)
    gt = diff_ref[...].astype(jnp.float32)
    mr = mix[:, 0]                              # (b_tile, tile_f, lanes)
    mi = mix[:, 1]
    gr = gt[:, 0]
    gi = gt[:, 1]

    # net_sound stand-in: per-pixel 1x1 channel mix + visual bias, tanh (EUP).
    kr = jnp.tanh(mr * w00 + mi * w10 + b0)
    ki = jnp.tanh(mr * w01 + mi * w11 + b1)

    # Complex spectrogram mask multiplication (the 'unet' branch arithmetic).
    p_re = mr * kr - mi * ki
    p_im = mr * ki + mi * kr

    pred_ref[:, 0, :, :] = p_re.astype(pred_ref.dtype)
    pred_ref[:, 1, :, :] = p_im.astype(pred_ref.dtype)

    # Per-(batch-tile, f-tile) partial sum of squared error (summed in wrapper).
    d_re = p_re - gr
    d_im = p_im - gi
    sq = d_re * d_re + d_im * d_im              # (b_tile, tile_f, lanes)
    if mask_rows:
        # Edge path only (f_keep not a multiple of 8): the single f-tile covers
        # the FULL F rows, so rows >= f_keep (the [:, :, :-1, :] trim) are
        # excluded from the loss here.  Never taken for typical STFT shapes.
        f_glob = jax.lax.broadcasted_iota(jnp.int32, sq.shape, 1)
        sq = jnp.where(f_glob < f_keep, sq, 0.0)
    err_ref[...] = jnp.broadcast_to(jnp.sum(sq), err_ref.shape)


def _vmem_plan():
    """Generation-aware budgets: ~64 MiB scoped / 8 MiB blocks on v5e/v6e
    (128 MiB VMEM), ~32 MiB / 4 MiB on v7x (64 MiB per TensorCore)."""
    try:
        cap = pltpu.get_tpu_info().vmem_capacity_bytes
    except Exception:  # conservative fallback if the query is unavailable
        cap = 64 * 1024 * 1024
    limit = int(min(cap // 2, 64 * 1024 * 1024))
    # 2 inputs + 1 output, double-buffered, plus Mosaic scratch headroom.
    block_budget = limit // 8
    return limit, block_budget


def _pick_tiles(B, F, f_keep, lanes, block_budget):
    bytes_per_frow = 2 * lanes * 4              # both channels, f32, lane-padded

    if f_keep % 8 == 0:
        # Typical STFT case (f_keep = n_fft/2, a power of two): tile the
        # trimmed range with an exact divisor of f_keep that is a multiple of
        # 8 -> no ragged tile, no masking, every block strictly in bounds.
        max_rows = max(8, block_budget // bytes_per_frow)
        tile_f = 8
        for cand in range(min(max_rows, f_keep), 7, -1):
            if cand % 8 == 0 and f_keep % cand == 0:
                tile_f = cand
                break
        n_f = f_keep // tile_f
        mask_rows = False
        out_f = f_keep
    else:
        # Edge case: one f-tile over the FULL F rows (block dim == array dim),
        # trim handled by an in-kernel row mask on the loss + a wrapper slice.
        tile_f = F
        n_f = 1
        mask_rows = True
        out_f = F

    # Fold batch items into a block while the budget allows; keep >= 2 grid
    # blocks when possible so both v7x TensorCores get work.
    per_b_bytes = 2 * tile_f * lanes * 4
    b_cap = max(1, block_budget // per_b_bytes)
    if n_f == 1 and B >= 2:
        b_cap = min(b_cap, B // 2)
    b_cap = min(b_cap, B)
    b_tile = 1
    for cand in range(b_cap, 0, -1):
        if B % cand == 0:
            b_tile = cand
            break
    n_b = B // b_tile
    return b_tile, n_b, tile_f, n_f, out_f, mask_rows


def spec_mask_and_mse(mix, diff, coef):
    """Fused Pallas hot path.

    mix, diff : [B, 2, F, T] spectrograms (re/im channel planes; f32 or bf16).
    coef      : [6] f32 = (w00, w10, w01, w11, b0, b1) mask-stub scalars.
    Returns (pred [B, 2, F-1, T], err) with err the mean squared error.
    """
    B, C, F, T = mix.shape
    assert C == 2 and F >= 2 and diff.shape == mix.shape
    f_keep = F - 1

    # Lane-dense T: pad to a multiple of 128 so pred stores are unmasked vst.
    # Zero-padded columns of both inputs contribute exactly 0 to the loss.
    lanes = _round_up(T, 128)
    if lanes != T:
        pad = ((0, 0), (0, 0), (0, 0), (0, lanes - T))
        mix_in = jnp.pad(mix, pad)
        diff_in = jnp.pad(diff, pad)
    else:
        mix_in, diff_in = mix, diff

    vmem_limit, block_budget = _vmem_plan()
    b_tile, n_b, tile_f, n_f, out_f, mask_rows = _pick_tiles(
        B, F, f_keep, lanes, block_budget)

    kernel = functools.partial(_spec_mask_mse_kernel, f_keep=f_keep,
                               mask_rows=mask_rows)

    io_spec = pl.BlockSpec((b_tile, 2, tile_f, lanes),
                           lambda bi, j, coef_ref: (bi, 0, j, 0))
    err_spec = pl.BlockSpec((1, 1, 1, 1),
                            lambda bi, j, coef_ref: (bi, j, 0, 0))

    pred, partials = pl.pallas_call(
        kernel,
        out_shape=(
            jax.ShapeDtypeStruct((B, 2, out_f, lanes), mix.dtype),
            jax.ShapeDtypeStruct((n_b, n_f, 1, 1), jnp.float32),
        ),
        grid_spec=pltpu.PrefetchScalarGridSpec(
            num_scalar_prefetch=1,
            grid=(n_b, n_f),
            in_specs=[io_spec, io_spec],        # mix, diff (full F passed in)
            out_specs=(io_spec, err_spec),      # stacked pred, MSE partials
        ),
        compiler_params=pltpu.CompilerParams(
            dimension_semantics=("parallel", "parallel"),
            vmem_limit_bytes=vmem_limit,
        ),
    )(coef, mix_in, diff_in)

    if out_f != f_keep or lanes != T:
        pred = pred[:, :, :f_keep, :T]
    err = jnp.sum(partials) / (B * 2 * f_keep * T)   # MSELoss (mean reduction)
    return pred, err


class NetWrapperPallas:
    """JAX/Pallas port of NetWrapper (arch_sound == 'unet')."""

    def __init__(self, key, feat_dim=8, vis_dim=4):
        k1, k2, k3 = jax.random.split(key, 3)
        # Deterministic stand-in parameters for the external sub-nets.
        self.Wv = 0.1 * jax.random.normal(k1, (feat_dim, vis_dim), jnp.float32)
        self.Wm = 0.5 * jax.random.normal(k2, (2, 2), jnp.float32)
        self.bm = 0.1 * jax.random.normal(k3, (vis_dim, 2), jnp.float32)

    def forward(self, batch_data):
        # TODO(synk): ME.SparseTensor + MinkowskiEngine sparse-conv net_vision has
        # no Pallas equivalent; replaced with a deterministic mean-pool + linear.
        feats = batch_data['feats']                      # [Npts, feat_dim]
        _coords = batch_data['coords']                   # [Npts, 4] (unused by stub)
        visual_feature = jnp.tanh(jnp.mean(feats, axis=0) @ self.Wv)  # [vis_dim]

        mix = batch_data['audio_mix_spec']               # [B, 2, F, T]
        diff = batch_data['audio_diff_spec']             # [B, 2, F, T]

        # TODO(synk): net_sound ('unet') is an external module; stand-in is a
        # per-pixel 1x1 channel mix conditioned on the visual feature + tanh,
        # fused into the Pallas kernel (pred_mask never materialized in HBM).
        bias = visual_feature @ self.bm                  # [2]
        coef = jnp.stack([self.Wm[0, 0], self.Wm[1, 0],
                          self.Wm[0, 1], self.Wm[1, 1],
                          bias[0], bias[1]]).astype(jnp.float32)      # [6]

        # Fused Pallas hot path: mask + complex multiply + MSE partials.
        pred, err = spec_mask_and_mse(mix, diff, coef)
        return err, {'pred_audio': pred}


if __name__ == "__main__":
    key = jax.random.PRNGKey(0)
    k_mix, k_diff, k_feat, k_coord, k_net = jax.random.split(key, 5)

    B, F, T = 2, 33, 128          # F-1 = 32 frequency bins kept; T lane-dense
    NPTS, FEAT_DIM = 32, 8

    batch_data = {
        'audio_mix_spec': jax.random.normal(k_mix, (B, 2, F, T), jnp.float32),
        'audio_diff_spec': jax.random.normal(k_diff, (B, 2, F, T), jnp.float32),
        'feats': jax.random.normal(k_feat, (NPTS, FEAT_DIM), jnp.float32),
        'coords': jax.random.randint(k_coord, (NPTS, 4), 0, 16, jnp.int32),
    }

    model = NetWrapperPallas(k_net, feat_dim=FEAT_DIM, vis_dim=4)
    err, out = model.forward(batch_data)
    jax.block_until_ready((err, out['pred_audio']))

    # Pure-JAX reference of the whole forward (same stand-in sub-nets).
    mix_trim = batch_data['audio_mix_spec'][:, :, :-1, :]
    gt = batch_data['audio_diff_spec'][:, :, :-1, :]
    vis = jnp.tanh(jnp.mean(batch_data['feats'], 0) @ model.Wv)
    mask = jnp.tanh(jnp.einsum('bcft,cd->bdft', mix_trim, model.Wm)
                    + (vis @ model.bm)[None, :, None, None])
    ref_re = mix_trim[:, 0] * mask[:, 0] - mix_trim[:, 1] * mask[:, 1]
    ref_im = mix_trim[:, 0] * mask[:, 1] + mix_trim[:, 1] * mask[:, 0]
    ref_pred = jnp.stack([ref_re, ref_im], 1)
    ref_err = jnp.mean((ref_pred - gt) ** 2)

    assert out['pred_audio'].shape == (B, 2, F - 1, T)
    assert jnp.allclose(out['pred_audio'], ref_pred, rtol=1e-4, atol=1e-4)
    assert jnp.allclose(err, ref_err, rtol=1e-4, atol=1e-5)

    print("KERNEL_OK")
</pallas_src>

<mosaic_0001>
module attributes {stable_mosaic.version = 11 : i64} {
  func.func @_spec_mask_mse_kernel(%arg0: i32, %arg1: i32, %arg2: memref<6xf32, #tpu.memory_space<smem>>, %arg3: memref<1x2x32x128xf32, #tpu.memory_space<vmem>>, %arg4: memref<1x2x32x128xf32, #tpu.memory_space<vmem>>, %arg5: memref<1x2x32x128xf32, #tpu.memory_space<vmem>>, %arg6: memref<1x1x1x1xf32, #tpu.memory_space<vmem>>) attributes {dimension_semantics = [#tpu.dimension_semantics<parallel>, #tpu.dimension_semantics<parallel>], iteration_bounds = array<i64: 2, 1>, scalar_prefetch = 1 : i64, scratch_operands = 0 : i64, tpu.core_type = #tpu.core_type<tc>, window_params = [{transform_indices = @transform_0, window_bounds = array<i64: 1, 2, 32, 128>}, {transform_indices = @transform_1, window_bounds = array<i64: 1, 2, 32, 128>}, {transform_indices = @transform_2, window_bounds = array<i64: 1, 2, 32, 128>}, {transform_indices = @transform_3, window_bounds = array<i64: 1, 1, 1, 1>}]} {
    %c0 = arith.constant 0 : index
    %0 = memref.load %arg2[%c0] : memref<6xf32, #tpu.memory_space<smem>>
    %c1 = arith.constant 1 : index
    %1 = memref.load %arg2[%c1] : memref<6xf32, #tpu.memory_space<smem>>
    %c2 = arith.constant 2 : index
    %2 = memref.load %arg2[%c2] : memref<6xf32, #tpu.memory_space<smem>>
    %c3 = arith.constant 3 : index
    %3 = memref.load %arg2[%c3] : memref<6xf32, #tpu.memory_space<smem>>
    %c4 = arith.constant 4 : index
    %4 = memref.load %arg2[%c4] : memref<6xf32, #tpu.memory_space<smem>>
    %c5 = arith.constant 5 : index
    %5 = memref.load %arg2[%c5] : memref<6xf32, #tpu.memory_space<smem>>
    %c0_0 = arith.constant 0 : index
    %c0_1 = arith.constant 0 : index
    %c0_2 = arith.constant 0 : index
    %c0_3 = arith.constant 0 : index
    %6 = vector.load %arg3[%c0_0, %c0_1, %c0_2, %c0_3] : memref<1x2x32x128xf32, #tpu.memory_space<vmem>>, vector<1x2x32x128xf32>
    %c0_4 = arith.constant 0 : index
    %c0_5 = arith.constant 0 : index
    %c0_6 = arith.constant 0 : index
    %c0_7 = arith.constant 0 : index
    %7 = vector.load %arg4[%c0_4, %c0_5, %c0_6, %c0_7] : memref<1x2x32x128xf32, #tpu.memory_space<vmem>>, vector<1x2x32x128xf32>
    %8 = vector.extract_strided_slice %6 {offsets = [0, 0, 0, 0], sizes = [1, 1, 32, 128], strides = [1, 1, 1, 1]} : vector<1x2x32x128xf32> to vector<1x1x32x128xf32>
    %9 = vector.shape_cast %8 : vector<1x1x32x128xf32> to vector<1x32x128xf32>
    %10 = vector.extract_strided_slice %6 {offsets = [0, 1, 0, 0], sizes = [1, 1, 32, 128], strides = [1, 1, 1, 1]} : vector<1x2x32x128xf32> to vector<1x1x32x128xf32>
    %11 = vector.shape_cast %10 : vector<1x1x32x128xf32> to vector<1x32x128xf32>
    %12 = vector.extract_strided_slice %7 {offsets = [0, 0, 0, 0], sizes = [1, 1, 32, 128], strides = [1, 1, 1, 1]} : vector<1x2x32x128xf32> to vector<1x1x32x128xf32>
    %13 = vector.shape_cast %12 : vector<1x1x32x128xf32> to vector<1x32x128xf32>
    %14 = vector.extract_strided_slice %7 {offsets = [0, 1, 0, 0], sizes = [1, 1, 32, 128], strides = [1, 1, 1, 1]} : vector<1x2x32x128xf32> to vector<1x1x32x128xf32>
    %15 = vector.shape_cast %14 : vector<1x1x32x128xf32> to vector<1x32x128xf32>
    %16 = vector.broadcast %0 : f32 to vector<1x32x128xf32>
    %17 = arith.mulf %9, %16 : vector<1x32x128xf32>
    %18 = vector.broadcast %1 : f32 to vector<1x32x128xf32>
    %19 = arith.mulf %11, %18 : vector<1x32x128xf32>
    %20 = arith.addf %17, %19 : vector<1x32x128xf32>
    %21 = vector.broadcast %4 : f32 to vector<1x32x128xf32>
    %22 = arith.addf %20, %21 : vector<1x32x128xf32>
    %23 = math.tanh %22 : vector<1x32x128xf32>
    %24 = vector.broadcast %2 : f32 to vector<1x32x128xf32>
    %25 = arith.mulf %9, %24 : vector<1x32x128xf32>
    %26 = vector.broadcast %3 : f32 to vector<1x32x128xf32>
    %27 = arith.mulf %11, %26 : vector<1x32x128xf32>
    %28 = arith.addf %25, %27 : vector<1x32x128xf32>
    %29 = vector.broadcast %5 : f32 to vector<1x32x128xf32>
    %30 = arith.addf %28, %29 : vector<1x32x128xf32>
    %31 = math.tanh %30 : vector<1x32x128xf32>
    %32 = arith.mulf %9, %23 : vector<1x32x128xf32>
    %33 = arith.mulf %11, %31 : vector<1x32x128xf32>
    %34 = arith.subf %32, %33 : vector<1x32x128xf32>
    %35 = arith.mulf %9, %31 : vector<1x32x128xf32>
    %36 = arith.mulf %11, %23 : vector<1x32x128xf32>
    %37 = arith.addf %35, %36 : vector<1x32x128xf32>
    %c0_8 = arith.constant 0 : index
    %c0_9 = arith.constant 0 : index
    %c0_10 = arith.constant 0 : index
    %c0_11 = arith.constant 0 : index
    %38 = vector.load %arg5[%c0_8, %c0_9, %c0_10, %c0_11] : memref<1x2x32x128xf32, #tpu.memory_space<vmem>>, vector<1x1x32x128xf32>
    %39 = vector.shape_cast %38 : vector<1x1x32x128xf32> to vector<1x32x128xf32>
    %40 = vector.shape_cast %34 : vector<1x32x128xf32> to vector<1x1x32x128xf32>
    tpu.vector_store %arg5[%c0_8, %c0_9, %c0_10, %c0_11], %40 {strides = array<i32>} : memref<1x2x32x128xf32, #tpu.memory_space<vmem>>, vector<1x1x32x128xf32>,
    %c0_12 = arith.constant 0 : index
    %c1_13 = arith.constant 1 : index
    %c0_14 = arith.constant 0 : index
    %c0_15 = arith.constant 0 : index
    %41 = vector.load %arg5[%c0_12, %c1_13, %c0_14, %c0_15] : memref<1x2x32x128xf32, #tpu.memory_space<vmem>>, vector<1x1x32x128xf32>
    %42 = vector.shape_cast %41 : vector<1x1x32x128xf32> to vector<1x32x128xf32>
    %43 = vector.shape_cast %37 : vector<1x32x128xf32> to vector<1x1x32x128xf32>
    tpu.vector_store %arg5[%c0_12, %c1_13, %c0_14, %c0_15], %43 {strides = array<i32>} : memref<1x2x32x128xf32, #tpu.memory_space<vmem>>, vector<1x1x32x128xf32>,
    %44 = arith.subf %34, %13 : vector<1x32x128xf32>
    %45 = arith.subf %37, %15 : vector<1x32x128xf32>
    %46 = arith.mulf %44, %44 : vector<1x32x128xf32>
    %47 = arith.mulf %45, %45 : vector<1x32x128xf32>
    %48 = arith.addf %46, %47 : vector<1x32x128xf32>
    %49 = vector.shape_cast %48 : vector<1x32x128xf32> to vector<1x1x32x128xf32>
    %cst = arith.constant dense<0.000000e+00> : vector<1xf32>
    %50 = vector.multi_reduction <add>, %49, %cst [1, 2, 3] : vector<1x1x32x128xf32> to vector<1xf32>
    %51 = vector.shape_cast %50 : vector<1xf32> to vector<1x1x1x1xf32>
    %52 = vector.extract %51[0, 0, 0, 0] : f32 from vector<1x1x1x1xf32>
    %53 = vector.broadcast %52 : f32 to vector<1x1x1x1xf32>
    %c0_16 = arith.constant 0 : index
    %c0_17 = arith.constant 0 : index
    %c0_18 = arith.constant 0 : index
    %c0_19 = arith.constant 0 : index
    %54 = vector.load %arg6[%c0_16, %c0_17, %c0_18, %c0_19] : memref<1x1x1x1xf32, #tpu.memory_space<vmem>>, vector<1x1x1x1xf32>
    tpu.vector_store %arg6[%c0_16, %c0_17, %c0_18, %c0_19], %53 {strides = array<i32>} : memref<1x1x1x1xf32, #tpu.memory_space<vmem>>, vector<1x1x1x1xf32>,
    return
  }
  func.func @transform_0(%arg0: i32, %arg1: i32, %arg2: memref<6xf32, #tpu.memory_space<smem>>) -> (i32, i32, i32, i32) {
    %c0_i32 = arith.constant 0 : i32
    %c0_i32_0 = arith.constant 0 : i32
    %c0_i32_1 = arith.constant 0 : i32
    return %arg0, %c0_i32, %arg1, %c0_i32_0 : i32, i32, i32, i32
  }
  func.func @transform_1(%arg0: i32, %arg1: i32, %arg2: memref<6xf32, #tpu.memory_space<smem>>) -> (i32, i32, i32, i32) {
    %c0_i32 = arith.constant 0 : i32
    %c0_i32_0 = arith.constant 0 : i32
    %c0_i32_1 = arith.constant 0 : i32
    return %arg0, %c0_i32, %arg1, %c0_i32_0 : i32, i32, i32, i32
  }
  func.func @transform_2(%arg0: i32, %arg1: i32, %arg2: memref<6xf32, #tpu.memory_space<smem>>) -> (i32, i32, i32, i32) {
    %c0_i32 = arith.constant 0 : i32
    %c0_i32_0 = arith.constant 0 : i32
    %c0_i32_1 = arith.constant 0 : i32
    return %arg0, %c0_i32, %arg1, %c0_i32_0 : i32, i32, i32, i32
  }
  func.func @transform_3(%arg0: i32, %arg1: i32, %arg2: memref<6xf32, #tpu.memory_space<smem>>) -> (i32, i32, i32, i32) {
    %c0_i32 = arith.constant 0 : i32
    %c0_i32_0 = arith.constant 0 : i32
    %c0_i32_1 = arith.constant 0 : i32
    return %arg0, %arg1, %c0_i32, %c0_i32_0 : i32, i32, i32, i32
  }
}

</mosaic_0001>

<bundles_post_ra>
// kernel: tpu_custom_call.1
= control target key start
LH: loop header
LB: loop body
LE: loop exit
PB: predicated region body
PF: predicated region fallthrough
CT: control target
= control target key end

     0   :  { %s1465_s0 = inlined_call_operand.vmem [shape: f32[6], index: 0, kind: input, shape index: {}]   ;;  %s1466_s1 = inlined_call_operand.vmem [shape: f32[2,2,33,128], index: 1, kind: input, shape index: {}]   ;;  %s1467_s2 = inlined_call_operand.vmem [shape: f32[2,2,33,128], index: 2, kind: input, shape index: {}]   ;;  %s1468_s3 = inlined_call_operand.hbm [shape: f32[2,2,32,128], index: 3, kind: output, shape index: {0}]   ;;  %s1469_s4 = inlined_call_operand.vmem [shape: f32[2,1,1,1], index: 4, kind: output, shape index: {1}]  }
   0x1   :  { %s10_s17 = sshll.u32 %s1465_s0, 4  ;;  %s11_s17 = int_to_ptr.vmem [resolvable:$true] %s10_s17 }
   0x2   :  { %s1099_s18 = scalar_lea.vmem %s11_s17, 16  ;;  %p1104_p1 = scmp.lt.s32.totalorder %s11_s17, %s11_s17 }
   0x3   :  { %p1100_p0 = scmp.ne.s32.totalorder %s11_s17, %s1099_s18  ;;  %p1105_p2 = scmp.lt.s32.totalorder %s1099_s18, %s1099_s18 }
   0x5   :  { %p1106_p3 = por %p1105_p2, %p1104_p1 }
   0x7   :  { %p1107_p4 = pnand %p1106_p3, %p1100_p0 }
   0x9   :  { %1110 = shalt.err (!%p1107_p4)  }
   0xa   :  { %s1233_s19 = smov [#allocation3]  }
   0xb   :  { %13 = dma.vmem_to_smem %s11_s17, 16, %s1233_s19, [#allocation2] }
   0xc   :  { %1195 = dma.done.wait [#allocation2], 16 }
   0xd   :  { %1196 = vsyncadd [#allocation2], 4294967280 }
   0xe   :  { %15 = sfence }
   0xf   :  { %16 = vsyncpa [#allocation7], 0 }
  0x10   :  { %18 = vsyncpa [#allocation7 + $0x1], 0  ;;  %s1265_s20 = smov 0   ;;  %s1267_s21 = smov 0  }
  0x11   :  { %s1269_s0 = smov 0   ;;  %s1271_s22 = smov 0  }
  0x12   :  { %s1273_s23 = smov 0   ;;  %s1275_s24 = smov 0  }
  0x13 LB: > { %s914_s25 = sadd.s32 4294967295, %s1223_s24   ;;  %s915_s26 = sadd.s32 4294967294, %s1223_s24   ;;  %s1223_s24 = sphi %s1275_s24, %s24_s24   ;;  %s1219_s23 = sphi %s1273_s23, %s1477_s23   ;;  %s1215_s22 = sphi %s1271_s22, %s1476_s22   ;;  %s1211_s0 = sphi %s1269_s0, %s1475_s0   ;;  %s1207_s21 = sphi %s1267_s21, %s1474_s21   ;;  %s1203_s20 = sphi %s1265_s20, %s1473_s20  }
  0x14   : > { %s36_s27 = sadd.s32 1, %s1219_s23  ;;  %s45_s28 = sadd.s32 1, %s1211_s0 }
  0x15   : > { %p38_p5 = scmp.ge.s32.totalorder %s36_s27, 2  ;;  %p52_p6 = scmp.ne.s32.totalorder %s1211_s0, %s1207_s21 }
  0x16   : > { %p53_p7 = scmp.eq.s32.totalorder %s1223_s24, 0  ;;  %p112_p8 = scmp.eq.s32.totalorder %s914_s25, 1 }
  0x17   : > { %s1479_s27 = smov (%p38_p5, %s36_s27), 0  ;;  %p117_p11 = scmp.ne.s32.totalorder %s1207_s21, %s1203_s20 }
  0x18   : > { %p1304_p9 = por %p53_p7, %p52_p6  ;;  %p1308_p10 = por %p112_p8, %p52_p6 }
  0x19   : > { %s40_s5 = ssub.s32 %s1219_s23, %s1479_s27  ;;  %p118_p13 = scmp.eq.s32.totalorder %s915_s26, 1 }
  0x1a   : > { %p43_p12 = scmp.eq.s32.totalorder %s40_s5, 0  ;;  %p917_p1 = scmp.ge.s32.totalorder %s1223_s24, 2 }
  0x1b   : > { %p1319_p0 = por %p118_p13, %p117_p11 }
  0x1c   : > { %s1317_s6 = scalar_select %p43_p12, %s1211_s0, %s45_s28  }
  0x1d   : > { %162 = sbr.rel (%p917_p1) target bundleno = 70 (0x46), region = 16 }
  0x24   : > { %165 = sbr.rel (!%p1304_p9) target bundleno = 53 (0x35), region = 20  ;;  %s167_s8 = sand.u32 (%p1304_p9), 1, %s1211_s0  }
  0x25   : > { %s957_s9 = smul.u32 (%p1304_p9), 80, %s1219_s23  ;;  %s918_s10 = sshll.u32 (%p1304_p9), %s167_s8, 6 }
  0x26   : > { %s169_s14 = scalar_lea.vmem (%p1304_p9), [#allocation4], %s918_s10   ;;  %s1225_s15 = smov (%p1304_p9), 0  }
  0x27   : > { %s179_s13 = scalar_lea.vmem (%p1304_p9), %s1466_s1, %s957_s9  }
  0x2b LB: >> { %v260_v0 = vld [vmem:[%s179_s13] sm:$0xff]  ;;  %v262_v1 = vld [vmem:[%s179_s13 + $0x8] sm:$0xff]  ;;  %v264_v2 = vld [vmem:[%s179_s13 + $0x10] sm:$0xff]  ;;  %s254_s15 = sadd.s32 1, %s1227_s15   ;;  %s1227_s15 = sphi %s1225_s15, %s254_s15  }
  0x2c   : >> { %261 = vst [vmem:[%s169_s14] sm:$0xff] %v260_v0  ;;  %263 = vst [vmem:[%s169_s14 + $0x8] sm:$0xff] %v262_v1  ;;  %v266_v3 = vld [vmem:[%s179_s13 + $0x18] sm:$0xff]  ;;  %v268_v4 = vld [vmem:[%s179_s13 + $0x28] sm:$0xff]  ;;  %p253_p2 = scmp.ge.s32.totalorder %s254_s15, 1 }
  0x2d   : >> { %265 = vst [vmem:[%s169_s14 + $0x10] sm:$0xff] %v264_v2  ;;  %v270_v5 = vld [vmem:[%s179_s13 + $0x30] sm:$0xff]  ;;  %267 = vst [vmem:[%s169_s14 + $0x18] sm:$0xff] %v266_v3  ;;  %v272_v6 = vld [vmem:[%s179_s13 + $0x38] sm:$0xff] }
  0x2e   : >> { %269 = vst [vmem:[%s169_s14 + $0x20] sm:$0xff] %v268_v4  ;;  %271 = vst [vmem:[%s169_s14 + $0x28] sm:$0xff] %v270_v5  ;;  %v274_v7 = vld [vmem:[%s179_s13 + $0x40] sm:$0xff]  ;;  %256 = sbr.rel (!%p253_p2) target bundleno = 43 (0x2b), region = 209 }
  0x2f   : >> { %273 = vst [vmem:[%s169_s14 + $0x30] sm:$0xff] %v272_v6  ;;  %275 = vst [vmem:[%s169_s14 + $0x38] sm:$0xff] %v274_v7 }
  0x35 PF: > { %315 = sbr.rel (!%p1304_p9) target bundleno = 70 (0x46), region = 72  ;;  %s317_s16 = sand.u32 (%p1304_p9), 1, %s1211_s0  }
  0x36   : > { %s958_s17 = smul.u32 (%p1304_p9), 80, %s1219_s23  ;;  %s928_s18 = sshll.u32 (%p1304_p9), %s317_s16, 6 }
  0x37   : > { %s319_s28 = scalar_lea.vmem (%p1304_p9), [#allocation5], %s928_s18   ;;  %s1229_s5 = smov (%p1304_p9), 0  }
  0x38   : > { %s329_s26 = scalar_lea.vmem (%p1304_p9), %s1467_s2, %s958_s17  }
  0x3c LB: >> { %v410_v8 = vld [vmem:[%s329_s26] sm:$0xff]  ;;  %v412_v9 = vld [vmem:[%s329_s26 + $0x8] sm:$0xff]  ;;  %v414_v10 = vld [vmem:[%s329_s26 + $0x10] sm:$0xff]  ;;  %s404_s5 = sadd.s32 1, %s1231_s5   ;;  %s1231_s5 = sphi %s1229_s5, %s404_s5  }
  0x3d   : >> { %411 = vst [vmem:[%s319_s28] sm:$0xff] %v410_v8  ;;  %413 = vst [vmem:[%s319_s28 + $0x8] sm:$0xff] %v412_v9  ;;  %v416_v11 = vld [vmem:[%s329_s26 + $0x18] sm:$0xff]  ;;  %v418_v12 = vld [vmem:[%s329_s26 + $0x28] sm:$0xff]  ;;  %p403_p3 = scmp.ge.s32.totalorder %s404_s5, 1 }
  0x3e   : >> { %415 = vst [vmem:[%s319_s28 + $0x10] sm:$0xff] %v414_v10  ;;  %v420_v13 = vld [vmem:[%s329_s26 + $0x30] sm:$0xff]  ;;  %417 = vst [vmem:[%s319_s28 + $0x18] sm:$0xff] %v416_v11  ;;  %v422_v14 = vld [vmem:[%s329_s26 + $0x38] sm:$0xff] }
  0x3f   : >> { %419 = vst [vmem:[%s319_s28 + $0x20] sm:$0xff] %v418_v12  ;;  %421 = vst [vmem:[%s319_s28 + $0x28] sm:$0xff] %v420_v13  ;;  %v424_v15 = vld [vmem:[%s329_s26 + $0x40] sm:$0xff]  ;;  %406 = sbr.rel (!%p403_p3) target bundleno = 60 (0x3c), region = 231 }
  0x40   : >> { %423 = vst [vmem:[%s319_s28 + $0x30] sm:$0xff] %v422_v14  ;;  %425 = vst [vmem:[%s319_s28 + $0x38] sm:$0xff] %v424_v15 }
  0x46 PF: > { %p938_p4 = scmp.ge.s32.totalorder %s1223_s24, 1  ;;  %p464_p5 = scmp.lt.s32.totalorder %s1223_s24, 3 }
  0x48   : > { %p465_p6 = pnand %p938_p4, %p464_p5 }
  0x49   : > { %s471_s29 = sand.u32 (!%p465_p6), 1, %s1207_s21   ;;  %s528_s8 = sld [smem:[#allocation3]] (!%p465_p6) }
  0x4a   : > { %468 = sbr.rel (%p465_p6) target bundleno = 327 (0x147), region = 124  ;;  %s1345_s9 = sshll.u32 (!%p465_p6), %s471_s29, 6 }
  0x4b   : > { %s942_s10 = sld [smem:[#allocation3 + $0x1]] (!%p465_p6)  ;;  %s943_s11 = sld [smem:[#allocation3 + $0x2]] (!%p465_p6) }
  0x4c   : > { %s473_s12 = scalar_lea.vmem (!%p465_p6), [#allocation4], %s1345_s9  ;;  %s944_s13 = sld [smem:[#allocation3 + $0x3]] (!%p465_p6) }
  0x4d   : > { %v1348_v16 = vld [vmem:[%s473_s12] sm:$0xff] (!%p465_p6)  ;;  %v1350_v17 = vld [vmem:[%s473_s12 + $0x8] sm:$0xff] (!%p465_p6)  ;;  %s945_s14 = sld [smem:[#allocation3 + $0x4]] (!%p465_p6)  ;;  %v1352_v18 = vld [vmem:[%s473_s12 + $0x10] sm:$0xff] (!%p465_p6)  ;;  %s946_s15 = sld [smem:[#allocation3 + $0x5]] (!%p465_p6) }
  0x4e   : > { %v1354_v19 = vld [vmem:[%s473_s12 + $0x18] sm:$0xff] (!%p465_p6)  ;;  %v538_v20 = vld [vmem:[%s473_s12 + $0x20] sm:$0xff] (!%p465_p6)  ;;  %v1356_v21 = vld [vmem:[%s473_s12 + $0x28] sm:$0xff] (!%p465_p6)  ;;  %s480_s16 = scalar_lea.vmem (!%p465_p6), [#allocation5], %s1345_s9  ;;  %s1392_s17 = scalar_lea.vmem (!%p465_p6), [#allocation6], %s1345_s9 }
  0x4f   : > { %v1358_v22 = vld [vmem:[%s473_s12 + $0x30] sm:$0xff] (!%p465_p6)  ;;  %v1360_v23 = vld [vmem:[%s473_s12 + $0x38] sm:$0xff] (!%p465_p6)  ;;  %v550_v24 = vstv (!%p465_p6), %s528_s8  ;;  %v542_v13 = vld [vmem:[%s480_s16] sm:$0xff] (!%p465_p6)  ;;  %s956_s18 = sshll.u32 (!%p465_p6), %s1215_s22, 10  ;;  %s686_s19 = sshll.u32 (!%p465_p6), %s1392_s17, 4  ;;  %s1409_s19 = int_to_ptr.vmem [resolvable:$true] %s686_s19 }
  0x50   : > { %v551_v25 = vmul.f32 (!%p465_p6), %v550_v24, %v1348_v16  ;;  %v552_v26 = vmul.f32 (!%p465_p6), %v550_v24, %v1350_v17  ;;  %v553_v27 = vmul.f32 (!%p465_p6), %v550_v24, %v1352_v18  ;;  %v554_v28 = vmul.f32 (!%p465_p6), %v550_v24, %v1354_v19  ;;  %v546_v14 = vld [vmem:[%s480_s16 + $0x20] sm:$0xff] (!%p465_p6)  ;;  %s1407_s28 = scalar_lea.hbm (!%p465_p6), %s1468_s3, %s956_s18  ;;  %s1413_s5 = scalar_lea.sflag (!%p465_p6), [#allocation7], %s471_s29 }
  0x51   : > { %v555_v29 = vstv %s942_s10  ;;  %v573_v35 = vstv %s943_s11  ;;  %s1111_s8 = scalar_lea.vmem %s1409_s19, 1024  ;;  %s1234_s9 = smov [#allocation6]  }
  0x52   : > { %v556_v30 = vmul.f32 %v555_v29, %v538_v20  ;;  %v557_v31 = vmul.f32 %v555_v29, %v1356_v21  ;;  %v558_v32 = vmul.f32 %v555_v29, %v1358_v22  ;;  %v559_v33 = vmul.f32 %v555_v29, %v1360_v23  ;;  %p1112_p7 = scmp.ne.s32.totalorder %s1409_s19, %s1111_s8  ;;  %s1115_s10 = sshll.u32 %s1234_s9, 4  ;;  %s1116_s10 = int_to_ptr.vmem [resolvable:$false] %s1115_s10 }
  0x53   : > { %v564_v34 = vstv %s945_s14  ;;  %v578_v36 = vstv %s944_s13  ;;  %v574_v41 = vmul.f32 %v573_v35, %v1348_v16  ;;  %v575_v42 = vmul.f32 %v573_v35, %v1350_v17  ;;  %s1117_s11 = scalar_lea.vmem %s1116_s10, 2048  ;;  %p1118_p11 = scmp.lt.s32.totalorder %s1409_s19, %s1116_s10 }
  0x54   : > { %v560_v37 = vadd.f32 %v556_v30, %v551_v25  ;;  %v561_v38 = vadd.f32 %v557_v31, %v552_v26  ;;  %v562_v39 = vadd.f32 %v558_v32, %v553_v27  ;;  %v563_v40 = vadd.f32 %v559_v33, %v554_v28  ;;  %v543_v28 = vld [vmem:[%s480_s16 + $0x8] sm:$0xff]  ;;  %v544_v32 = vld [vmem:[%s480_s16 + $0x10] sm:$0xff]  ;;  %p1113_p8 = pnand %p1112_p7, %p1308_p10  ;;  %p1119_p12 = scmp.lt.s32.totalorder %s1117_s11, %s1111_s8 }
  0x55   : > { %v576_v43 = vmul.f32 %v573_v35, %v1352_v18  ;;  %v577_v47 = vmul.f32 %v573_v35, %v1354_v19  ;;  %v579_v48 = vmul.f32 %v578_v36, %v538_v20  ;;  %v580_v49 = vmul.f32 %v578_v36, %v1356_v21  ;;  %v548_v33 = vld [vmem:[%s480_s16 + $0x30] sm:$0xff] }
  0x56   : > { %v565_v44 = vadd.f32 %v564_v34, %v560_v37  ;;  %v566_v45 = vadd.f32 %v564_v34, %v561_v38  ;;  %v567_v46 = vadd.f32 %v564_v34, %v562_v39  ;;  %v581_v50 = vmul.f32 %v578_v36, %v1358_v22  ;;  %v549_v37 = vld [vmem:[%s480_s16 + $0x38] sm:$0xff]  ;;  %p1114_p9 = pneg %p1113_p8  ;;  %p1120_p13 = por %p1119_p12, %p1118_p11 }
  0x57   : > { %v582_v51 = vmul.f32 %v578_v36, %v1360_v23  ;;  %v568_v52 = vadd.f32 %v564_v34, %v563_v40  ;;  %v587_v53 = vstv %s946_s15  ;;  %v583_v54 = vadd.f32 %v579_v48, %v574_v41  ;;  %v545_v36 = vld [vmem:[%s480_s16 + $0x18] sm:$0xff] }
  0x58   : > { %1083 = vtanh.f32 %v565_v44  ;;  %v584_v55 = vadd.f32 %v580_v49, %v575_v42  ;;  %v585_v56 = vadd.f32 %v581_v50, %v576_v43  ;;  %p1121_p2 = pnand %p1120_p13, %p1114_p9 }
  0x59   : > { %1085 = vtanh.f32 %v566_v45  ;;  %v586_v57 = vadd.f32 %v582_v51, %v577_v47  ;;  %v588_v58 = vadd.f32 %v587_v53, %v583_v54 }
  0x5a   : > { %1087 = vtanh.f32 %v567_v46  ;;  %v589_v59 = vadd.f32 %v587_v53, %v584_v55  ;;  %v590_v60 = vadd.f32 %v587_v53, %v585_v56 }
  0x5b   : > { %1089 = vtanh.f32 %v568_v52  ;;  %v591_v61 = vadd.f32 %v587_v53, %v586_v57 }
  0x5c   : > { %1091 = vtanh.f32 %v588_v58 }
  0x5d   : > { %1093 = vtanh.f32 %v589_v59 }
  0x5e   : > { %1095 = vtanh.f32 %v590_v60 }
  0x5f   : > { %1097 = vtanh.f32 %v591_v61 }
  0x62   : > { %v1084_v62 = vpop.eup %1083 }
  0x63   : > { %v1086_v63 = vpop.eup %1085  ;;  %v596_v2 = vmul.f32 %v1084_v62, %v1348_v16  ;;  %v612_v3 = vmul.f32 %v1084_v62, %v538_v20 }
  0x64   : > { %v1088_v0 = vpop.eup %1087  ;;  %v597_v5 = vmul.f32 %v1086_v63, %v1350_v17  ;;  %v613_v6 = vmul.f32 %v1086_v63, %v1356_v21 }
  0x65   : > { %v1090_v1 = vpop.eup %1089  ;;  %v598_v8 = vmul.f32 %v1088_v0, %v1352_v18  ;;  %v614_v11 = vmul.f32 %v1088_v0, %v1358_v22 }
  0x66   : > { %v1092_v4 = vpop.eup %1091  ;;  %v599_v15 = vmul.f32 %v1090_v1, %v1354_v19  ;;  %v615_v26 = vmul.f32 %v1090_v1, %v1360_v23 }
  0x67   : > { %v1094_v7 = vpop.eup %1093  ;;  %v600_v9 = vmul.f32 %v1092_v4, %v538_v20  ;;  %v608_v10 = vmul.f32 %v1092_v4, %v1348_v16  ;;  %v547_v20 = vld [vmem:[%s480_s16 + $0x28] sm:$0xff] }
  0x68   : > { %v1096_v12 = vpop.eup %1095  ;;  %v601_v24 = vmul.f32 %v1094_v7, %v1356_v21  ;;  %v609_v25 = vmul.f32 %v1094_v7, %v1350_v17 }
  0x69   : > { %v1098_v27 = vpop.eup %1097  ;;  %v602_v16 = vmul.f32 %v1096_v12, %v1358_v22  ;;  %v604_v29 = vsub.f32 %v596_v2, %v600_v9  ;;  %v610_v30 = vmul.f32 %v1096_v12, %v1352_v18  ;;  %v616_v31 = vadd.f32 %v612_v3, %v608_v10 }
  0x6a   : > { %v603_v34 = vmul.f32 %v1098_v27, %v1360_v23  ;;  %v605_v35 = vsub.f32 %v597_v5, %v601_v24  ;;  %v611_v21 = vmul.f32 %v1098_v27, %v1354_v19  ;;  %v617_v17 = vadd.f32 %v613_v6, %v609_v25 }
  0x6b   : > { %v606_v38 = vsub.f32 %v598_v8, %v602_v16  ;;  %v618_v39 = vadd.f32 %v614_v11, %v610_v30  ;;  %620 = vst [vmem:[%s1392_s17] sm:$0xff] %v604_v29  ;;  %947 = vst [vmem:[%s1392_s17 + $0x20] sm:$0xff] %v616_v31  ;;  %v629_v18 = vsub.f32 %v604_v29, %v542_v13 }
  0x6c   : > { %v633_v22 = vsub.f32 %v616_v31, %v546_v14  ;;  %v607_v19 = vsub.f32 %v599_v15, %v603_v34  ;;  %v619_v23 = vadd.f32 %v615_v26, %v611_v21  ;;  %621 = vst [vmem:[%s1392_s17 + $0x8] sm:$0xff] %v605_v35  ;;  %948 = vst [vmem:[%s1392_s17 + $0x28] sm:$0xff] %v617_v17 }
  0x6d   : > { %v630_v40 = vsub.f32 %v605_v35, %v543_v28  ;;  %v634_v41 = vsub.f32 %v617_v17, %v547_v20  ;;  %622 = vst [vmem:[%s1392_s17 + $0x10] sm:$0xff] %v606_v38  ;;  %949 = vst [vmem:[%s1392_s17 + $0x30] sm:$0xff] %v618_v39  ;;  %v631_v42 = vsub.f32 %v606_v38, %v544_v32 }
  0x6e   : > { %v635_v43 = vsub.f32 %v618_v39, %v548_v33  ;;  %v637_v44 = vmul.f32 %v629_v18, %v629_v18  ;;  %v641_v45 = vmul.f32 %v633_v22, %v633_v22  ;;  %623 = vst [vmem:[%s1392_s17 + $0x18] sm:$0xff] %v607_v19  ;;  %950 = vst [vmem:[%s1392_s17 + $0x38] sm:$0xff] %v619_v23 }
  0x6f   : > { %v632_v46 = vsub.f32 %v607_v19, %v545_v36  ;;  %v636_v47 = vsub.f32 %v619_v23, %v549_v37  ;;  %v638_v48 = vmul.f32 %v630_v40, %v630_v40  ;;  %v642_v49 = vmul.f32 %v634_v41, %v634_v41 }
  0x70   : > { %v639_v50 = vmul.f32 %v631_v42, %v631_v42  ;;  %v643_v51 = vmul.f32 %v635_v43, %v635_v43  ;;  %v645_v52 = vadd.f32 %v641_v45, %v637_v44 }
  0x71   : > { %v640_v53 = vmul.f32 %v632_v46, %v632_v46  ;;  %v644_v54 = vmul.f32 %v636_v47, %v636_v47  ;;  %v646_v55 = vadd.f32 %v642_v49, %v638_v48 }
  0x72   : > { %v647_v56 = vadd.f32 %v643_v51, %v639_v50 }
  0x73   : > { %v648_v57 = vadd.f32 %v644_v54, %v640_v53  ;;  %v649_v58 = vadd.f32 %v646_v55, %v645_v52 }
  0x75   : > { %v650_v59 = vadd.f32 %v649_v58, %v647_v56 }
  0x77   : > { %v651_v60 = vadd.f32 %v650_v59, %v648_v57 }
  0x79   : > { %652 = vadd.xlane.f32.xlu0 %v651_v60 }
  0x7a   : > { %1124 = shalt.err (!%p1121_p2)
}
  0x7b   : > { %s1125_s29 = scalar_lea.hbm %s1407_s28, 1024  ;;  %s1129_s14 = scalar_lea.hbm %s1468_s3, 2048 }
  0x7c   : > { %p1126_p3 = scmp.ne.s32.totalorder %s1407_s28, %s1125_s29  ;;  %p1130_p6 = scmp.lt.u32.totalorder %s1407_s28, %s1468_s3 }
  0x7d   : > { %p1131_p7 = scmp.lt.u32.totalorder %s1129_s14, %s1125_s29  ;;  %p1133_p9 = scmp.lt.u32.totalorder %s1125_s29, %s1407_s28 }
  0x7e   : > { %p1127_p4 = pnand %p1126_p3, %p1308_p10 }
  0x7f   : > { %p1132_p8 = por %p1131_p7, %p1130_p6 }
  0x80   : > { %p1128_p5 = pneg %p1127_p4 }
  0x81   : > { %p1134_p11 = por %p1133_p9, %p1132_p8 }
  0x83   : > { %p1135_p12 = pnand %p1134_p11, %p1128_p5 }
  0x85   : > { %1138 = shalt.err (!%p1135_p12)
}
  0x86   : > { %s1235_s17 = smov 128   ;;  %s1236_s18 = smov 8   ;;  %vm662_vm0 = vcmask 0  }
  0x87   : > { %961 = dma.vmem_to_hbm [thread:$0]  (%p1308_p10), %s1409_s19, 1024, %s1407_s28, %s1413_s5, %s1235_s17, %s1235_s17, %s1236_s18  }
  0x88   : > { %p522_p13 = scmp.lt.s32.totalorder %s1215_s22, 1 }
  0x8a   : > { %s1481_s22 = smov (!%p522_p13, %s1215_s22), 1 }
  0x8b   : > { %s527_s8 = scalar_lea.vmem %s1469_s4, %s1481_s22 }
 0x106   : > { %v653_v61 = vpop.xlane.xlu0 %652 }
 0x107   : > { %v654_v62 = vrot.slane %v653_v61, 4 }
 0x109   : > { %v655_v63 = vadd.f32 %v654_v62, %v653_v61 }
 0x10b   : > { %v656_v0 = vrot.slane %v655_v63, 2 }
 0x10d   : > { %v657_v1 = vadd.f32 %v656_v0, %v655_v63 }
 0x10f   : > { %v658_v2 = vrot.slane %v657_v1, 1 }
 0x111   : > { %v659_v3 = vadd.f32 %v658_v2, %v657_v1 }
 0x113   : > { %959 = vpush %v659_v3 }
 0x144   : > { %s960_s9 = spop %959 }
 0x145   : > { %v661_v4 = vstv %s960_s9 }
 0x146   : > { %663 = vst.msk [vmem:[%s527_s8] sm:$0x1] %vm662_vm0, %v661_v4 }
 0x147 PF: > { %s704_s30 = sand.u32 1, %s1203_s20   ;;  %p964_p10 = pnand %p917_p1, %p1319_p0 }
 0x148   : > { %s705_s19 = scalar_lea.sflag [#allocation7], %s704_s30 }
 0x149   : > { %1198 = dma.done.wait (!%p964_p10), %s705_s19, 1024  }
 0x14a   : > { %1200 = vsyncadd (!%p964_p10), %s705_s19, 4294966272  ;;  %s24_s24 = sadd.s32 1, %s1223_s24   ;;  %s1473_s20 = smov %s1207_s21 }
 0x14b   : > { %p21_p2 = scmp.ge.s32.totalorder %s24_s24, 4   ;;  %s1474_s21 = smov %s1211_s0 }
 0x14c   : > { %s1475_s0 = smov %s1317_s6  ;;  %s1476_s22 = smov %s1219_s23 }
 0x14d   : > { %s1477_s23 = smov %s1479_s27  ;;  %23 = sbr.rel (!%p21_p2) target bundleno = 19 (0x13), region = 253 }
 0x154   :  { %719 = vsyncpa [#allocation7], 1 }
 0x155   :  { %721 = vsyncpa [#allocation7 + $0x1], 1 }

</bundles_post_ra>
